<compile_context>
chip_gen: v6e
topology: v6e:2x2x1
jax: 0.10.0
libtpu: 0.0.40
codegen_flags: <defaults>
</compile_context>

<pallas_src>
import functools
import math

import jax
import jax.numpy as jnp
from jax import lax
from jax.experimental import pallas as pl
from jax.experimental.pallas import tpu as pltpu

ACT_DTYPE = jnp.bfloat16
USE_PALLAS = True  # flipped in __main__ to build the pure-XLA reference for the e2e check


def _round_up(v, m):
    return ((v + m - 1) // m) * m


def _pick_tiling(M, tm_cap=1024):
    """Pick tm so that (a) tm divides M -> no wrapper-side M padding, (b) tm is a
    multiple of 16 (bf16 sublane packing), (c) the grid has >=2 blocks whenever M
    allows it (keeps both v7x TensorCores busy), (d) tm <= 1024."""
    cap = min(tm_cap, M)
    if M >= 32:
        cap = min(cap, M // 2)           # >= 2 grid blocks (v7x dual TC)
    best = 0
    t = 16
    while t <= cap:
        if M % t == 0:
            best = t
        t += 16
    if best:
        return best, M
    # Fallback (not hit for this network's shapes): pad M up to a 16-aligned tile.
    tm = min(256, _round_up(M, 16))
    return tm, _round_up(M, tm)


# ----------- Pallas fused (pre-ReLU) matmul + BN-affine (+post-ReLU) kernel -----------
def _mm_affine_kernel(a_ref, b_ref, s_ref, c_ref, o_ref, *, pre_relu, apply_relu, n_out):
    a = a_ref[...]
    if pre_relu:
        a = jnp.maximum(a, 0.0)
    acc = jnp.dot(a, b_ref[...], preferred_element_type=jnp.float32)
    y = acc * s_ref[...] + c_ref[...]
    if apply_relu:
        y = jnp.maximum(y, 0.0)
    # store only the real output channels (no padded-128 store, no downstream slice)
    o_ref[...] = y[:, :n_out].astype(o_ref.dtype)


def matmul_affine(a, w, s, c, n_out, pre_relu=False, apply_relu=False):
    """relu?((relu?(a) @ w) * s + c)[:, :n_out]  ->  (M, n_out) bf16.

    a: (M, K) activations (bf16).  w: (K, Np) bf16 with Np a multiple of 128 (padded
    once at init).  s, c: (1, Np) f32 BN scale / bias rows."""
    a = a.astype(ACT_DTYPE)
    M, K = a.shape
    Kw, Np = w.shape
    assert K == Kw and Np % 128 == 0 and n_out <= Np

    if not USE_PALLAS:  # pure-XLA reference path (same bf16 math) for the e2e check
        x = jnp.maximum(a, 0.0) if pre_relu else a
        y = jnp.dot(x, w, preferred_element_type=jnp.float32) * s + c
        if apply_relu:
            y = jnp.maximum(y, 0.0)
        return y[:, :n_out].astype(ACT_DTYPE)

    tm, Mp = _pick_tiling(M)
    if Mp != M:
        a = jnp.pad(a, ((0, Mp - M), (0, 0)))
    out = pl.pallas_call(
        functools.partial(_mm_affine_kernel, pre_relu=pre_relu,
                          apply_relu=apply_relu, n_out=n_out),
        out_shape=jax.ShapeDtypeStruct((Mp, n_out), ACT_DTYPE),
        grid=(Mp // tm,),
        in_specs=[pl.BlockSpec((tm, K), lambda i: (i, 0)),
                  pl.BlockSpec((K, Np), lambda i: (0, 0)),
                  pl.BlockSpec((1, Np), lambda i: (0, 0)),
                  pl.BlockSpec((1, Np), lambda i: (0, 0))],
        out_specs=pl.BlockSpec((tm, n_out), lambda i: (i, 0)),
        compiler_params=pltpu.CompilerParams(
            dimension_semantics=("parallel",)),
    )(a, w, s, c)
    if Mp != M:
        out = out[:M]
    return out


class PwParams:
    """1x1-conv weight in matmul layout + BN affine, lane-padded to 128 ONCE at init."""

    def __init__(self, w_mat, scale, bias):
        K, N = w_mat.shape
        Np = _round_up(N, 128)
        self.w = jnp.pad(jnp.asarray(w_mat, jnp.float32),
                         ((0, 0), (0, Np - N))).astype(ACT_DTYPE)
        self.s = jnp.pad(jnp.asarray(scale, jnp.float32).reshape(1, N),
                         ((0, 0), (0, Np - N)))
        self.c = jnp.pad(jnp.asarray(bias, jnp.float32).reshape(1, N),
                         ((0, 0), (0, Np - N)))
        self.n_out = N


def conv1x1_bn(x, p, pre_relu=False, apply_relu=False):
    """1x1 conv (NHWC) + BN affine with optional fused pre/post ReLU on the MXU."""
    N, H, W, C = x.shape
    out = matmul_affine(x.reshape(N * H * W, C), p.w, p.s, p.c, p.n_out,
                        pre_relu=pre_relu, apply_relu=apply_relu)
    return out.reshape(N, H, W, p.n_out)


# ----------------------------- XLA-side helpers (bf16) -----------------------------
def relu(x):
    return jnp.maximum(x, 0.0)


def depthwise_conv(x, w_hwio, stride, padding, dilation):
    """Depthwise conv via XLA; a block-diagonal dense weight would waste the MXU."""
    C = x.shape[-1]
    return lax.conv_general_dilated(
        x, w_hwio.astype(x.dtype), window_strides=(stride, stride),
        padding=[(padding, padding), (padding, padding)],
        rhs_dilation=(dilation, dilation),
        dimension_numbers=('NHWC', 'HWIO', 'NHWC'),
        feature_group_count=C)


def max_pool2d(x, k, stride, padding):
    pads = [(0, 0), (padding, padding), (padding, padding), (0, 0)]
    return lax.reduce_window(x, jnp.array(-jnp.inf, dtype=x.dtype), lax.max,
                             (1, k, k, 1), (1, stride, stride, 1), pads)


def avg_pool2d(x, k, stride, padding):
    # count_include_pad=False semantics (NAO/DARTS-style pooling op).
    pads = [(0, 0), (padding, padding), (padding, padding), (0, 0)]
    s = lax.reduce_window(x, jnp.array(0, dtype=x.dtype), lax.add,
                          (1, k, k, 1), (1, stride, stride, 1), pads)
    ones = jnp.ones((1, x.shape[1], x.shape[2], 1), x.dtype)
    cnt = lax.reduce_window(ones, jnp.array(0, dtype=x.dtype), lax.add,
                            (1, k, k, 1), (1, stride, stride, 1), pads)
    return s / cnt


# ----------------------------- parameter init -----------------------------
class Init:
    """Deterministic kaiming_normal_ (fan_in) initializer, mirrors init_parameters()."""

    def __init__(self, key):
        self.key = key

    def kaiming(self, shape):
        self.key, sub = jax.random.split(self.key)
        fan_in = 1
        for d in shape[1:]:
            fan_in *= int(d)
        std = math.sqrt(2.0 / fan_in)
        return jax.random.normal(sub, shape, jnp.float32) * std


def bn_affine(C, eps=1e-5):
    """Eval-mode BatchNorm2d folded to per-channel (scale, bias); fresh running stats."""
    gamma = jnp.ones((C,), jnp.float32)
    beta = jnp.zeros((C,), jnp.float32)
    mean = jnp.zeros((C,), jnp.float32)
    var = jnp.ones((C,), jnp.float32)
    scale = gamma / jnp.sqrt(var + eps)
    bias = beta - mean * scale
    return scale, bias


def _to_mat(w_oihw):
    """OIHW conv weight -> (KH*KW*Cin, Cout) matmul weight."""
    Cout, Cin, KH, KW = w_oihw.shape
    return jnp.transpose(w_oihw, (2, 3, 1, 0)).reshape(KH * KW * Cin, Cout)


def _to_dw(w):
    """PyTorch depthwise weight (C,1,KH,KW) -> HWIO (KH,KW,1,C)."""
    return jnp.transpose(w, (2, 3, 1, 0))


# ----------------------------- NAO-WS building blocks -----------------------------
class ReLUConvBN:
    def __init__(self, init, C_in, C_out, k, stride=1, padding=0):
        assert k == 1 and stride == 1 and padding == 0  # only 1x1 instances exist here
        scale, bias = bn_affine(C_out)
        self.p = PwParams(_to_mat(init.kaiming((C_out, C_in, k, k))), scale, bias)

    def __call__(self, x):
        return conv1x1_bn(x, self.p, pre_relu=True)      # preceding ReLU fused


class FactorizedReduce:
    """Both 1x1 stride-2 convs fused into ONE Pallas call: the two shifted/strided
    views are concatenated along K and multiplied by a block-diagonal weight, so the
    channel-concat of the two halves comes directly out of the matmul."""

    def __init__(self, init, C_in, C_out):
        assert C_out % 2 == 0
        half = C_out // 2
        w1 = _to_mat(init.kaiming((half, C_in, 1, 1)))   # (C_in, half)
        w2 = _to_mat(init.kaiming((half, C_in, 1, 1)))
        w = jnp.zeros((2 * C_in, C_out), jnp.float32)
        w = w.at[:C_in, :half].set(w1)
        w = w.at[C_in:, half:].set(w2)
        scale, bias = bn_affine(C_out)
        self.p = PwParams(w, scale, bias)

    def __call__(self, x, pre_relu=False):
        N, H, W, C = x.shape
        p1 = x[:, ::2, ::2, :]
        if (H % 2) or (W % 2):
            xs = jnp.pad(x, ((0, 0), (0, 1), (0, 1), (0, 0)))[:, 1:, 1:, :]
            p2 = xs[:, ::2, ::2, :]
        else:
            p2 = x[:, 1::2, 1::2, :]
        OH, OW = p1.shape[1], p1.shape[2]
        patches = jnp.concatenate([p1, p2], axis=-1)     # (N, OH, OW, 2C)
        out = matmul_affine(patches.reshape(N * OH * OW, 2 * C),
                            self.p.w, self.p.s, self.p.c, self.p.n_out,
                            pre_relu=pre_relu)
        return out.reshape(N, OH, OW, self.p.n_out)


class MaybeCalibrateSize:
    def __init__(self, init, layers, channels):
        hw = [layers[0][0], layers[1][0]]
        c = [layers[0][-1], layers[1][-1]]
        self.channels = channels
        self.pre_x = None
        self.pre_y = None
        self.x_reduce = False
        x_out = [hw[0], hw[0], c[0]]
        y_out = [hw[1], hw[1], c[1]]
        if hw[0] != hw[1]:
            assert hw[0] == 2 * hw[1]
            self.x_reduce = True
            self.pre_x = FactorizedReduce(init, c[0], channels)
            x_out = [hw[1], hw[1], channels]
        elif c[0] != channels:
            self.pre_x = ReLUConvBN(init, c[0], channels, 1, 1, 0)
            x_out = [hw[0], hw[0], channels]
        if c[1] != channels:
            self.pre_y = ReLUConvBN(init, c[1], channels, 1, 1, 0)
            y_out = [hw[1], hw[1], channels]
        self.out_shape = [x_out, y_out]

    def __call__(self, s0, s1):
        if self.x_reduce:
            s0 = self.pre_x(s0, pre_relu=True)           # relu(x) fused into the call
        elif self.pre_x is not None:
            s0 = self.pre_x(s0)
        if self.pre_y is not None:
            s1 = self.pre_y(s1)
        return s0, s1


class WSSepConv:
    # NB: bn1/bn2 are built with C_in channels as in the reference (C_in == C_out here).
    def __init__(self, init, num_inputs, C_in, C_out, k, padding):
        self.padding = padding
        s1, b1 = bn_affine(C_in)
        s2, b2 = bn_affine(C_in)
        self.W1_dw = [_to_dw(init.kaiming((C_in, 1, k, k))).astype(ACT_DTYPE)
                      for _ in range(num_inputs)]
        self.W1_pw = [PwParams(_to_mat(init.kaiming((C_out, C_in, 1, 1))), s1, b1)
                      for _ in range(num_inputs)]
        self.W2_dw = [_to_dw(init.kaiming((C_in, 1, k, k))).astype(ACT_DTYPE)
                      for _ in range(num_inputs)]
        self.W2_pw = [PwParams(_to_mat(init.kaiming((C_out, C_in, 1, 1))), s2, b2)
                      for _ in range(num_inputs)]

    def __call__(self, x, x_id, stride):
        x = relu(x)
        x = depthwise_conv(x, self.W1_dw[x_id], stride, self.padding, 1)
        # pointwise + bn1 + the following ReLU fused into the matmul epilogue
        x = conv1x1_bn(x, self.W1_pw[x_id], apply_relu=True)
        x = depthwise_conv(x, self.W2_dw[x_id], 1, self.padding, 1)
        x = conv1x1_bn(x, self.W2_pw[x_id])
        return x


class WSDilConv:
    def __init__(self, init, num_inputs, C_in, C_out, k, padding, dilation):
        self.padding, self.dilation = padding, dilation
        scale, bias = bn_affine(C_out)
        self.W_dw = [_to_dw(init.kaiming((C_in, 1, k, k))).astype(ACT_DTYPE)
                     for _ in range(num_inputs)]
        self.W_pw = [PwParams(_to_mat(init.kaiming((C_out, C_in, 1, 1))), scale, bias)
                     for _ in range(num_inputs)]

    def __call__(self, x, x_id, stride):
        x = relu(x)
        x = depthwise_conv(x, self.W_dw[x_id], stride, self.padding, self.dilation)
        return conv1x1_bn(x, self.W_pw[x_id])


class WSReLUConvBN:
    def __init__(self, init, num_inputs, C_out, C_in, k):
        assert k == 1
        self.w = [_to_mat(init.kaiming((C_out, C_in, k, k))) for _ in range(num_inputs)]
        self.scale, self.bias = bn_affine(C_out)

    def __call__(self, x, x_ids):
        # candidate 1x1 weights concatenated along K (trace-time constant); one MXU call
        # with the preceding ReLU fused in.
        w = jnp.concatenate([self.w[i] for i in x_ids], axis=0)
        p = PwParams(w, self.scale, self.bias)
        return conv1x1_bn(x, p, pre_relu=True)


class Node:
    def __init__(self, init, prev_layers, channels, stride, node_id):
        self.channels, self.stride = channels, stride
        n_in = node_id + 2

        def make_branch():
            ops = {
                'sep3': WSSepConv(init, n_in, channels, channels, 3, 1),
                'sep5': WSSepConv(init, n_in, channels, channels, 5, 2),
                'dil3': WSDilConv(init, n_in, channels, channels, 3, 2, 2),
                'dil5': WSDilConv(init, n_in, channels, channels, 5, 4, 2),
            }
            if stride > 1:
                assert stride == 2
                ops['id_reduce_1'] = FactorizedReduce(init, prev_layers[0][-1], channels)
                ops['id_reduce_2'] = FactorizedReduce(init, prev_layers[1][-1], channels)
            return ops

        self.x_ops = make_branch()
        self.y_ops = make_branch()
        self.out_shape = [prev_layers[0][0] // stride,
                          prev_layers[0][1] // stride, channels]

    def _apply(self, ops, v, v_id, v_op):
        stride = self.stride if v_id in (0, 1) else 1
        if v_op == 0:
            return max_pool2d(v, 3, stride, 1)
        if v_op == 1:
            return avg_pool2d(v, 3, stride, 1)
        if v_op == 2:
            if stride > 1:
                return ops['id_reduce_1'](v) if v_id == 0 else ops['id_reduce_2'](v)
            return v
        if v_op == 3:
            return ops['sep3'](v, v_id, stride)
        if v_op == 4:
            return ops['sep5'](v, v_id, stride)
        if v_op == 5:
            return ops['dil3'](v, v_id, stride)
        if v_op == 6:
            return ops['dil5'](v, v_id, stride)
        raise ValueError("bad op %s" % v_op)

    def __call__(self, x, x_id, x_op, y, y_id, y_op):
        # eval mode: apply_drop_path is training-only and skipped
        x = self._apply(self.x_ops, x, x_id, x_op)
        y = self._apply(self.y_ops, y, y_id, y_op)
        return x + y


class Cell:
    def __init__(self, init, prev_layers, nodes, channels, reduction):
        assert len(prev_layers) == 2
        self.reduction = reduction
        self.nodes = nodes
        prev_layers = [list(prev_layers[0]), list(prev_layers[1])]
        self.calib = MaybeCalibrateSize(init, prev_layers, channels)
        prev_layers = [list(s) for s in self.calib.out_shape]
        stride = 2 if reduction else 1
        self.ops = []
        for i in range(nodes):
            node = Node(init, prev_layers, channels, stride, i)
            self.ops.append(node)
            prev_layers.append(node.out_shape)
        out_hw = min(shape[0] for shape in prev_layers)
        if reduction:
            self.fac_1 = FactorizedReduce(init, prev_layers[0][-1], channels)
            self.fac_2 = FactorizedReduce(init, prev_layers[1][-1], channels)
        self.final = WSReLUConvBN(init, nodes + 2, channels, channels, 1)
        self.out_shape = [out_hw, out_hw, channels]

    def __call__(self, s0, s1, arch):
        s0, s1 = self.calib(s0, s1)
        states = [s0, s1]
        used = [0] * (self.nodes + 2)
        for i in range(self.nodes):
            x_id, x_op = arch[2 * i]
            y_id, y_op = arch[2 * i + 1]
            used[x_id] += 1
            used[y_id] += 1
            out = self.ops[i](states[x_id], x_id, x_op, states[y_id], y_id, y_op)
            states.append(out)
        concat = [i for i, c in enumerate(used) if c == 0]
        if self.reduction:
            if 0 in concat:
                states[0] = self.fac_1(states[0])
            if 1 in concat:
                states[1] = self.fac_2(states[1])
        out = jnp.concatenate([states[i] for i in concat], axis=-1)
        return self.final(out, concat)


class NASWSNetworkCIFAR:
    def __init__(self, init, classes, layers, nodes, channels,
                 keep_prob, drop_path_keep_prob, use_aux_head, steps):
        self.classes = classes
        self.pool_layers = [layers, 2 * layers + 1]
        self.total_layers = layers * 3 + 2
        stem_ch = 3 * channels
        # Stem 3x3 conv stays on XLA's conv (K=27 too small for the MXU; no HBM im2col),
        # with the eval-mode BN scale folded into the weights.
        w = init.kaiming((stem_ch, 3, 3, 3))
        scale, bias = bn_affine(stem_ch)
        self.stem_w = (jnp.transpose(w, (2, 3, 1, 0))
                       * scale.reshape(1, 1, 1, stem_ch)).astype(ACT_DTYPE)
        self.stem_b = bias.astype(ACT_DTYPE)
        outs = [[32, 32, stem_ch], [32, 32, stem_ch]]
        ch = channels
        self.cells = []
        for i in range(self.total_layers):
            if i not in self.pool_layers:
                cell = Cell(init, outs, nodes, ch, False)
            else:
                ch *= 2
                cell = Cell(init, outs, nodes, ch, True)
            self.cells.append(cell)
            outs = [outs[-1], cell.out_shape]
        # TODO(synk): AuxHeadCIFAR omitted (use_aux_head=False; training-only output).
        self.classifier_w = init.kaiming((classes, outs[-1][-1]))
        self.classifier_b = jnp.zeros((classes,), jnp.float32)

    def __call__(self, x, arch):
        conv_arch, reduc_arch = arch
        x = jnp.transpose(x, (0, 2, 3, 1)).astype(ACT_DTYPE)   # NCHW -> NHWC bf16 once
        s = lax.conv_general_dilated(
            x, self.stem_w, window_strides=(1, 1), padding=[(1, 1), (1, 1)],
            dimension_numbers=('NHWC', 'HWIO', 'NHWC'))
        s = s + self.stem_b
        s0 = s1 = s
        for cell in self.cells:
            if cell.reduction:
                s0, s1 = s1, cell(s0, s1, reduc_arch)
            else:
                s0, s1 = s1, cell(s0, s1, conv_arch)
        out = jnp.mean(s1.astype(jnp.float32), axis=(1, 2))    # AdaptiveAvgPool2d(1)
        # Dropout(1 - keep_prob) is identity in eval mode; classifier too small for Pallas.
        logits = jnp.dot(out, self.classifier_w.T) + self.classifier_b[None, :]
        return logits, None


# ----------------------------- demo -----------------------------
if __name__ == "__main__":
    key = jax.random.PRNGKey(0)
    k_in, k_param, k_a, k_b = jax.random.split(key, 4)

    # --- unit check of the fused Pallas kernel against an explicit XLA reference ---
    a = jax.random.normal(k_a, (256, 20), jnp.float32)
    b = jax.random.normal(k_b, (20, 12), jnp.float32)
    sc = jnp.full((12,), 1.3, jnp.float32)
    bi = jnp.full((12,), 0.2, jnp.float32)
    p = PwParams(b, sc, bi)
    got = matmul_affine(a, p.w, p.s, p.c, p.n_out, pre_relu=True, apply_relu=True)
    a_r = jnp.maximum(a.astype(jnp.bfloat16).astype(jnp.float32), 0.0)
    b_r = b.astype(jnp.bfloat16).astype(jnp.float32)
    ref = jnp.maximum(jnp.dot(a_r, b_r, precision=lax.Precision.HIGHEST) * sc + bi, 0.0)
    assert bool(jnp.allclose(got.astype(jnp.float32), ref, atol=5e-2, rtol=5e-2))

    # --- build the network and run the full eval-mode forward through Pallas ---
    classes, layers, nodes, channels = 10, 1, 2, 4
    net = NASWSNetworkCIFAR(Init(k_param), classes, layers, nodes, channels,
                            keep_prob=1.0, drop_path_keep_prob=0.9,
                            use_aux_head=False, steps=1)

    x = jax.random.normal(k_in, (2, 3, 32, 32), jnp.float32)
    # arch entries are (input_id, op_id); ops: 0 max, 1 avg, 2 identity/reduce,
    # 3 sep3, 4 sep5, 5 dil3, 6 dil5.
    conv_arch = [(0, 3), (1, 0), (0, 4), (1, 5)]
    reduc_arch = [(1, 2), (1, 1), (2, 3), (2, 6)]
    arch = (conv_arch, reduc_arch)

    fwd = jax.jit(lambda inp: net(inp, arch)[0])
    logits = jax.block_until_ready(fwd(x))
    assert logits.shape == (2, classes)
    assert bool(jnp.all(jnp.isfinite(logits)))

    # --- end-to-end check vs a pure-XLA trace of the SAME bf16 math (no Pallas) ---
    USE_PALLAS = False
    ref_fwd = jax.jit(lambda inp: net(inp, arch)[0])
    ref_logits = jax.block_until_ready(ref_fwd(x))
    USE_PALLAS = True
    assert bool(jnp.allclose(logits, ref_logits, atol=3e-2, rtol=3e-2))

    print("KERNEL_OK")
</pallas_src>

<mosaic_0001>
module attributes {stable_mosaic.version = 11 : i64} {
  func.func @_mm_affine_kernel(%arg0: i32, %arg1: memref<128x20xbf16, #tpu.memory_space<vmem>>, %arg2: memref<20x128xbf16, #tpu.memory_space<vmem>>, %arg3: memref<1x128xf32, #tpu.memory_space<vmem>>, %arg4: memref<1x128xf32, #tpu.memory_space<vmem>>, %arg5: memref<128x12xbf16, #tpu.memory_space<vmem>>) attributes {dimension_semantics = [#tpu.dimension_semantics<parallel>], iteration_bounds = array<i64: 2>, scalar_prefetch = 0 : i64, scratch_operands = 0 : i64, tpu.core_type = #tpu.core_type<tc>, window_params = [{transform_indices = @transform_0, window_bounds = array<i64: 128, 20>}, {pipeline_mode = #tpu.pipeline_mode<synchronous>, transform_indices = @transform_1, window_bounds = array<i64: 20, 128>}, {pipeline_mode = #tpu.pipeline_mode<synchronous>, transform_indices = @transform_2, window_bounds = array<i64: 1, 128>}, {pipeline_mode = #tpu.pipeline_mode<synchronous>, transform_indices = @transform_3, window_bounds = array<i64: 1, 128>}, {transform_indices = @transform_4, window_bounds = array<i64: 128, 12>}]} {
    %c0 = arith.constant 0 : index
    %c0_0 = arith.constant 0 : index
    %0 = vector.load %arg1[%c0, %c0_0] : memref<128x20xbf16, #tpu.memory_space<vmem>>, vector<128x20xbf16>
    %cst = arith.constant 0.000000e+00 : bf16
    %1 = vector.broadcast %cst : bf16 to vector<128x20xbf16>
    %2 = arith.maximumf %0, %1 : vector<128x20xbf16>
    %c0_1 = arith.constant 0 : index
    %c0_2 = arith.constant 0 : index
    %3 = vector.load %arg2[%c0_1, %c0_2] : memref<20x128xbf16, #tpu.memory_space<vmem>>, vector<20x128xbf16>
    %cst_3 = arith.constant dense<0.000000e+00> : vector<128x128xf32>
    %4 = tpu.matmul %2, %3, %cst_3 {dimension_numbers = #tpu.dot_dimension_numbers<[1], [0], [0], [1], [0, 0, 1, 1], [], []>} : vector<128x20xbf16>, vector<20x128xbf16>, vector<128x128xf32> -> vector<128x128xf32>
    %c0_4 = arith.constant 0 : index
    %c0_5 = arith.constant 0 : index
    %5 = vector.load %arg3[%c0_4, %c0_5] : memref<1x128xf32, #tpu.memory_space<vmem>>, vector<1x128xf32>
    %6 = vector.broadcast %5 : vector<1x128xf32> to vector<128x128xf32>
    %7 = arith.mulf %4, %6 : vector<128x128xf32>
    %c0_6 = arith.constant 0 : index
    %c0_7 = arith.constant 0 : index
    %8 = vector.load %arg4[%c0_6, %c0_7] : memref<1x128xf32, #tpu.memory_space<vmem>>, vector<1x128xf32>
    %9 = vector.broadcast %8 : vector<1x128xf32> to vector<128x128xf32>
    %10 = arith.addf %7, %9 : vector<128x128xf32>
    %cst_8 = arith.constant 0.000000e+00 : f32
    %11 = vector.broadcast %cst_8 : f32 to vector<128x128xf32>
    %12 = arith.maximumf %10, %11 : vector<128x128xf32>
    %13 = vector.extract_strided_slice %12 {offsets = [0, 0], sizes = [128, 12], strides = [1, 1]} : vector<128x128xf32> to vector<128x12xf32>
    %14 = arith.truncf %13 : vector<128x12xf32> to vector<128x12xbf16>
    %c0_9 = arith.constant 0 : index
    %c0_10 = arith.constant 0 : index
    %15 = vector.load %arg5[%c0_9, %c0_10] : memref<128x12xbf16, #tpu.memory_space<vmem>>, vector<128x12xbf16>
    tpu.vector_store %arg5[%c0_9, %c0_10], %14 {strides = array<i32>} : memref<128x12xbf16, #tpu.memory_space<vmem>>, vector<128x12xbf16>,
    return
  }
  func.func @transform_0(%arg0: i32) -> (i32, i32) {
    %c0_i32 = arith.constant 0 : i32
    %c0_i32_0 = arith.constant 0 : i32
    return %arg0, %c0_i32 : i32, i32
  }
  func.func @transform_1(%arg0: i32) -> (i32, i32) {
    %c0_i32 = arith.constant 0 : i32
    %c0_i32_0 = arith.constant 0 : i32
    %c0_i32_1 = arith.constant 0 : i32
    return %c0_i32, %c0_i32_0 : i32, i32
  }
  func.func @transform_2(%arg0: i32) -> (i32, i32) {
    %c0_i32 = arith.constant 0 : i32
    %c0_i32_0 = arith.constant 0 : i32
    %c0_i32_1 = arith.constant 0 : i32
    return %c0_i32, %c0_i32_0 : i32, i32
  }
  func.func @transform_3(%arg0: i32) -> (i32, i32) {
    %c0_i32 = arith.constant 0 : i32
    %c0_i32_0 = arith.constant 0 : i32
    %c0_i32_1 = arith.constant 0 : i32
    return %c0_i32, %c0_i32_0 : i32, i32
  }
  func.func @transform_4(%arg0: i32) -> (i32, i32) {
    %c0_i32 = arith.constant 0 : i32
    %c0_i32_0 = arith.constant 0 : i32
    return %arg0, %c0_i32 : i32, i32
  }
}

</mosaic_0001>

<bundles_post_ra>
// kernel: tpu_custom_call.1
= control target key start
LH: loop header
LB: loop body
LE: loop exit
PB: predicated region body
PF: predicated region fallthrough
CT: control target
= control target key end

     0   :  { %s755_s15 = smov 0   ;;  %s887_s0 = inlined_call_operand.vmem [shape: bf16[256,20], index: 0, kind: input, shape index: {}]   ;;  %s888_s1 = inlined_call_operand.vmem [shape: bf16[20,128], index: 1, kind: input, shape index: {}]   ;;  %s889_s2 = inlined_call_operand.vmem [shape: f32[1,128], index: 2, kind: input, shape index: {}]   ;;  %s890_s3 = inlined_call_operand.vmem [shape: f32[1,128], index: 3, kind: input, shape index: {}]   ;;  %s891_s4 = inlined_call_operand.vmem [shape: bf16[256,12], index: 4, kind: output, shape index: {}]  }
   0x1 LB: > { %s611_s16 = sadd.s32 4294967295, %s727_s15   ;;  %p615_p0 = scmp.ge.s32.totalorder %s727_s15, 1  ;;  %s727_s15 = sphi %s755_s15, %s14_s15  }
   0x2   : > { %p163_p1 = scmp.lt.s32.totalorder %s727_s15, 3 }
   0x4   : > { %p164_p2 = pnand %p615_p0, %p163_p1 }
   0x5   : > { %s616_s21 = sshll.u32 (!%p164_p2), %s611_s16, 4 }
   0x6   : > { %167 = sbr.rel (%p164_p2) target bundleno = 237 (0xed), region = 36  ;;  %p190_p3 = scmp.lt.s32.totalorder (!%p164_p2), %s616_s21, 31 }
   0xb   : > { %v719_v0 = vld [vmem:[%s888_s1 + $0x8] ss:$0 sps:$4 sm:$0x33]   ;;  %vm311_vm0 = vcmask 1041408   ;;  %v720_v1 = vld [vmem:[%s888_s1] sm:$0xff]   ;;  %s893_s21 = smov (!%p190_p3, %s616_s21), 31 }
   0xc   : > { %708 = vmatprep.subr.msk.bf16.mxu0 %vm311_vm0, %v719_v0  ;;  %709 = vmatprep.subr.msk.bf16.mxu1 %vm311_vm0, %v719_v0  ;;  %v313_v2 = vsel %vm311_vm0, %v719_v0, 0  ;;  %s617_s22 = sshll.u32 %s893_s21, 2  ;;  %vm286_vm1 = vcmask 162816   ;;  %v729_v6 = vmov 0   ;;  %v806_v44 = vld [vmem:[%s889_s2] ss:$0 sm:$0xff] }
   0xd   : > { %685 = vmatpush3.bf16.msra.mxu0 %v313_v2  ;;  %706 = vmatpush3.bf16.msra.mxu1 %v313_v2  ;;  %s777_s25 = scalar_lea.vmem %s887_s0, %s617_s22  ;;  %v811_v46 = vld [vmem:[%s890_s3] ss:$0 sm:$0xff]  ;;  %s826_s6 = scalar_lea.vmem %s891_s4, %s617_s22  ;;  %vm538_vm2 = vcmask 93184  }
   0xe   : > { %686 = vmatprep.subr.bf16.mxu0 %v720_v1  ;;  %705 = vmatprep.subr.bf16.mxu1 %v720_v1  ;;  %v202_v3 = vld [vmem:[%s777_s25] sm:$0xf]  ;;  %v203_v4 = vld [vmem:[%s777_s25 + $0x4] sm:$0xf]  ;;  %v204_v11 = vld [vmem:[%s777_s25 + $0x8] sm:$0xf] }
   0xf   : > { %v210_v5 = vld [vmem:[%s777_s25 + $0x20] sm:$0xf]  ;;  %v218_v7 = vmax.bf16 %v729_v6, %v202_v3  ;;  %v219_v8 = vmax.bf16 %v729_v6, %v203_v4  ;;  %v211_v9 = vld [vmem:[%s777_s25 + $0x24] sm:$0xf]  ;;  %v205_v12 = vld [vmem:[%s777_s25 + $0xc] sm:$0xf]  ;;  %v220_v14 = vmax.bf16 %v729_v6, %v204_v11 }
  0x10   : > { %v226_v10 = vmax.bf16 %v729_v6, %v210_v5  ;;  %v227_v13 = vmax.bf16 %v729_v6, %v211_v9  ;;  %v221_v15 = vmax.bf16 %v729_v6, %v205_v12  ;;  %v212_v16 = vld [vmem:[%s777_s25 + $0x28] sm:$0xf]  ;;  %v213_v17 = vld [vmem:[%s777_s25 + $0x2c] sm:$0xf]  ;;  %v206_v18 = vld [vmem:[%s777_s25 + $0x10] sm:$0xf] }
  0x11   : > { %687 = vmatpush3.bf16.msra.mxu0 %v720_v1  ;;  %707 = vmatpush3.bf16.msra.mxu1 %v720_v1  ;;  %v620_v19 = vcombine.low %v218_v7, %v219_v8  ;;  %v228_v20 = vmax.bf16 %v729_v6, %v212_v16  ;;  %v229_v21 = vmax.bf16 %v729_v6, %v213_v17  ;;  %v207_v22 = vld [vmem:[%s777_s25 + $0x14] sm:$0xf]  ;;  %v214_v24 = vld [vmem:[%s777_s25 + $0x30] sm:$0xf]  ;;  %v208_v30 = vld [vmem:[%s777_s25 + $0x18] sm:$0xf] }
  0x12   : > { %v222_v23 = vmax.bf16 %v729_v6, %v206_v18  ;;  %v215_v25 = vld [vmem:[%s777_s25 + $0x34] sm:$0xf]  ;;  %v624_v26 = vcombine.low %v226_v10, %v227_v13  ;;  %v621_v27 = vcombine.low %v220_v14, %v221_v15  ;;  %v223_v28 = vmax.bf16 %v729_v6, %v207_v22  ;;  %v209_v31 = vld [vmem:[%s777_s25 + $0x1c] sm:$0xf]  ;;  %v216_v32 = vld [vmem:[%s777_s25 + $0x38] sm:$0xf] }
  0x13   : > { %v230_v29 = vmax.bf16 %v729_v6, %v214_v24  ;;  %688 = vmatprep.mubr.msk.bf16.mxu0 %vm286_vm1, %v620_v19  ;;  %v625_v33 = vcombine.low %v228_v20, %v229_v21  ;;  %v231_v34 = vmax.bf16 %v729_v6, %v215_v25  ;;  %v217_v35 = vld [vmem:[%s777_s25 + $0x3c] sm:$0xf]  ;;  %v224_v37 = vmax.bf16 %v729_v6, %v208_v30 }
  0x14   : > { %696 = vmatprep.mubr.msk.bf16.mxu1 %vm286_vm1, %v624_v26  ;;  %689 = vmatmul.mubr.msk.bf16.vlgmr.msra.gmra.mxu0 %vm286_vm1, %v621_v27  ;;  %v622_v36 = vcombine.low %v222_v23, %v223_v28  ;;  %v225_v38 = vmax.bf16 %v729_v6, %v209_v31  ;;  %v232_v40 = vmax.bf16 %v729_v6, %v216_v32 }
  0x15   : > { %697 = vmatmul.mubr.msk.bf16.vlgmr.msra.gmra.mxu1 %vm286_vm1, %v625_v33  ;;  %v626_v39 = vcombine.low %v230_v29, %v231_v34  ;;  %v233_v41 = vmax.bf16 %v729_v6, %v217_v35 }
  0x16   : > { %692 = vmatprep.mubr.msk.bf16.mxu0 %vm286_vm1, %v622_v36  ;;  %v623_v42 = vcombine.low %v224_v37, %v225_v38 }
  0x17   : > { %700 = vmatprep.mubr.msk.bf16.mxu1 %vm286_vm1, %v626_v39  ;;  %v627_v43 = vcombine.low %v232_v40, %v233_v41 }
  0x1c   : > { %693 = vmatmul.mubr.msk.bf16.gmra.mxu0 %vm286_vm1, %v623_v42 }
  0x1d   : > { %701 = vmatmul.mubr.msk.bf16.gmra.mxu1 %vm286_vm1, %v627_v43 }
  0xd4   : > { %v690_v45 = vpop.f32.mrf.mxu0 }
  0xd5   : > { %v421_v47 = vmul.f32 %v690_v45, %v806_v44  ;;  %v698_v48 = vpop.f32.mrf.mxu1 }
  0xd6   : > { %v429_v49 = vmul.f32 %v698_v48, %v806_v44  ;;  %v349_v50 = vpop.f32.mrf.mxu0 }
  0xd7   : > { %v444_v51 = vadd.f32 %v811_v46, %v421_v47  ;;  %v419_v52 = vmul.f32 %v806_v44, %v349_v50  ;;  %v381_v53 = vpop.f32.mrf.mxu1 }
  0xd8   : > { %v452_v54 = vadd.f32 %v811_v46, %v429_v49  ;;  %v427_v55 = vmul.f32 %v806_v44, %v381_v53  ;;  %v691_v56 = vpop.f32.mrf.mxu0 }
  0xd9   : > { %v460_v57 = vmax.f32 %v444_v51, 0.0  ;;  %v442_v58 = vadd.f32 %v811_v46, %v419_v52  ;;  %v422_v59 = vmul.f32 %v691_v56, %v806_v44  ;;  %v699_v60 = vpop.f32.mrf.mxu1 }
  0xda   : > { %v468_v61 = vmax.f32 %v452_v54, 0.0  ;;  %v450_v62 = vadd.f32 %v811_v46, %v427_v55  ;;  %v430_v63 = vmul.f32 %v699_v60, %v806_v44  ;;  %v352_v0 = vpop.f32.mrf.mxu0 }
  0xdb   : > { %v660_v1 = vpack.c.bf16 %v460_v57, %v460_v57  ;;  %v458_v2 = vmax.f32 %v442_v58, 0.0  ;;  %v445_v3 = vadd.f32 %v811_v46, %v422_v59  ;;  %v420_v4 = vmul.f32 %v806_v44, %v352_v0  ;;  %v384_v5 = vpop.f32.mrf.mxu1 }
  0xdc   : > { %v668_v6 = vpack.c.bf16 %v468_v61, %v468_v61  ;;  %v466_v7 = vmax.f32 %v450_v62, 0.0  ;;  %v453_v8 = vadd.f32 %v811_v46, %v430_v63  ;;  %v428_v9 = vmul.f32 %v806_v44, %v384_v5  ;;  %v694_v10 = vpop.f32.mrf.mxu0 }
  0xdd   : > { %541 = vst.msk [vmem:[%s826_s6 + $0x8] sm:$0xf] %vm538_vm2, %v660_v1  ;;  %v658_v11 = vpack.c.bf16 %v458_v2, %v458_v2  ;;  %v461_v12 = vmax.f32 %v445_v3, 0.0  ;;  %v443_v13 = vadd.f32 %v811_v46, %v420_v4  ;;  %v425_v14 = vmul.f32 %v694_v10, %v806_v44  ;;  %v702_v15 = vpop.f32.mrf.mxu1 }
  0xde   : > { %549 = vst.msk [vmem:[%s826_s6 + $0x28] sm:$0xf] %vm538_vm2, %v668_v6  ;;  %v666_v16 = vpack.c.bf16 %v466_v7, %v466_v7  ;;  %v469_v17 = vmax.f32 %v453_v8, 0.0  ;;  %v451_v18 = vadd.f32 %v811_v46, %v428_v9  ;;  %v433_v19 = vmul.f32 %v702_v15, %v806_v44  ;;  %v365_v20 = vpop.f32.mrf.mxu0 }
  0xdf   : > { %539 = vst.msk [vmem:[%s826_s6] sm:$0xf] %vm538_vm2, %v658_v11  ;;  %v661_v21 = vpack.c.bf16 %v461_v12, %v461_v12  ;;  %v459_v22 = vmax.f32 %v443_v13, 0.0  ;;  %v448_v23 = vadd.f32 %v811_v46, %v425_v14  ;;  %v423_v24 = vmul.f32 %v806_v44, %v365_v20  ;;  %v397_v25 = vpop.f32.mrf.mxu1 }
  0xe0   : > { %547 = vst.msk [vmem:[%s826_s6 + $0x20] sm:$0xf] %vm538_vm2, %v666_v16  ;;  %v669_v26 = vpack.c.bf16 %v469_v17, %v469_v17  ;;  %v467_v27 = vmax.f32 %v451_v18, 0.0  ;;  %v456_v28 = vadd.f32 %v811_v46, %v433_v19  ;;  %v431_v29 = vmul.f32 %v806_v44, %v397_v25  ;;  %v695_v30 = vpop.f32.mrf.mxu0 }
  0xe1   : > { %542 = vst.msk [vmem:[%s826_s6 + $0xc] sm:$0xf] %vm538_vm2, %v661_v21  ;;  %v659_v31 = vpack.c.bf16 %v459_v22, %v459_v22  ;;  %v464_v32 = vmax.f32 %v448_v23, 0.0  ;;  %v446_v33 = vadd.f32 %v811_v46, %v423_v24  ;;  %v426_v34 = vmul.f32 %v695_v30, %v806_v44  ;;  %v703_v35 = vpop.f32.mrf.mxu1 }
  0xe2   : > { %550 = vst.msk [vmem:[%s826_s6 + $0x2c] sm:$0xf] %vm538_vm2, %v669_v26  ;;  %v667_v36 = vpack.c.bf16 %v467_v27, %v467_v27  ;;  %v472_v37 = vmax.f32 %v456_v28, 0.0  ;;  %v454_v38 = vadd.f32 %v811_v46, %v431_v29  ;;  %v434_v39 = vmul.f32 %v703_v35, %v806_v44  ;;  %v368_v40 = vpop.f32.mrf.mxu0 }
  0xe3   : > { %540 = vst.msk [vmem:[%s826_s6 + $0x4] sm:$0xf] %vm538_vm2, %v659_v31  ;;  %v664_v41 = vpack.c.bf16 %v464_v32, %v464_v32  ;;  %v462_v42 = vmax.f32 %v446_v33, 0.0  ;;  %v449_v43 = vadd.f32 %v811_v46, %v426_v34  ;;  %v424_v45 = vmul.f32 %v806_v44, %v368_v40  ;;  %v400_v47 = vpop.f32.mrf.mxu1 }
  0xe4   : > { %548 = vst.msk [vmem:[%s826_s6 + $0x24] sm:$0xf] %vm538_vm2, %v667_v36  ;;  %v672_v48 = vpack.c.bf16 %v472_v37, %v472_v37  ;;  %v470_v49 = vmax.f32 %v454_v38, 0.0  ;;  %v457_v50 = vadd.f32 %v811_v46, %v434_v39  ;;  %v432_v51 = vmul.f32 %v806_v44, %v400_v47 }
  0xe5   : > { %545 = vst.msk [vmem:[%s826_s6 + $0x18] sm:$0xf] %vm538_vm2, %v664_v41  ;;  %v662_v52 = vpack.c.bf16 %v462_v42, %v462_v42  ;;  %v465_v53 = vmax.f32 %v449_v43, 0.0  ;;  %v447_v54 = vadd.f32 %v811_v46, %v424_v45 }
  0xe6   : > { %553 = vst.msk [vmem:[%s826_s6 + $0x38] sm:$0xf] %vm538_vm2, %v672_v48  ;;  %v670_v55 = vpack.c.bf16 %v470_v49, %v470_v49  ;;  %v473_v56 = vmax.f32 %v457_v50, 0.0  ;;  %v455_v57 = vadd.f32 %v811_v46, %v432_v51 }
  0xe7   : > { %543 = vst.msk [vmem:[%s826_s6 + $0x10] sm:$0xf] %vm538_vm2, %v662_v52  ;;  %v665_v58 = vpack.c.bf16 %v465_v53, %v465_v53  ;;  %v463_v59 = vmax.f32 %v447_v54, 0.0 }
  0xe8   : > { %551 = vst.msk [vmem:[%s826_s6 + $0x30] sm:$0xf] %vm538_vm2, %v670_v55  ;;  %v673_v44 = vpack.c.bf16 %v473_v56, %v473_v56  ;;  %v471_v60 = vmax.f32 %v455_v57, 0.0 }
  0xe9   : > { %546 = vst.msk [vmem:[%s826_s6 + $0x1c] sm:$0xf] %vm538_vm2, %v665_v58  ;;  %v663_v61 = vpack.c.bf16 %v463_v59, %v463_v59 }
  0xea   : > { %554 = vst.msk [vmem:[%s826_s6 + $0x3c] sm:$0xf] %vm538_vm2, %v673_v44  ;;  %v671_v62 = vpack.c.bf16 %v471_v60, %v471_v60 }
  0xeb   : > { %544 = vst.msk [vmem:[%s826_s6 + $0x14] sm:$0xf] %vm538_vm2, %v663_v61 }
  0xec   : > { %552 = vst.msk [vmem:[%s826_s6 + $0x34] sm:$0xf] %vm538_vm2, %v671_v62 }
  0xed PF: > { %s14_s15 = sadd.s32 1, %s727_s15  }
  0xee   : > { %p11_p4 = scmp.ge.s32.totalorder %s14_s15, 4  }
  0xf0   :  { %13 = sbr.rel (!%p11_p4) target bundleno = 1 (0x1), region = 66 }

</bundles_post_ra>
